<compile_context>
chip_gen: v6e
topology: v6e:2x2x1
jax: 0.10.0
libtpu: 0.0.40
codegen_flags: <defaults>
</compile_context>

<pallas_src>
import functools
import math

import jax
import jax.numpy as jnp
from jax.experimental import pallas as pl
from jax.experimental.pallas import tpu as pltpu


def _round_up(x: int, m: int) -> int:
    return ((x + m - 1) // m) * m


def _cdiv(a: int, b: int) -> int:
    return -(-a // b)


def _balanced_block(total: int, unit: int, cap: int) -> int:
    """Block size (multiple of `unit`, <= cap floored to `unit`) splitting
    `total` (a multiple of `unit`) into near-equal blocks."""
    cap = max(unit, (cap // unit) * unit)
    n = _cdiv(total, cap)
    return _round_up(_cdiv(total, n), unit)


def _make_alpha_loss_kernel(alpha, tr, tc, R, C, need_mask, flat):
    """Kernel computing one scalar partial sum per (tr, tc) tile."""
    is_kl = (alpha == 1.0)

    def kernel(p_ref, q_ref, o_ref):
        p = p_ref[...].astype(jnp.float32)
        q = q_ref[...].astype(jnp.float32)

        if is_kl:
            # Exactly the reference formula: P * log(P / Q).
            term = p * jnp.log(p / q)
        elif alpha == 2.0:
            # P^2 * Q^-1 without any log/exp.
            term = (p * p) / q
        elif alpha == 0.5:
            # sqrt(P * Q): one EUP op per element.
            term = jnp.sqrt(p * q)
        else:
            # Generic alpha: P^a * Q^(1-a) = exp(a*log P + (1-a)*log Q).
            term = jnp.exp(alpha * jnp.log(p) + (1.0 - alpha) * jnp.log(q))

        if need_mask:
            # Ragged-edge masking: static R, C, tr, tc closed over; block
            # offsets come from the grid position.  Garbage in the invalid
            # region (including NaN/inf) is discarded by the select.
            row = pl.program_id(0) * tr + jax.lax.broadcasted_iota(
                jnp.int32, (tr, tc), 0)
            col = pl.program_id(1) * tc + jax.lax.broadcasted_iota(
                jnp.int32, (tr, tc), 1)
            mask = (row < R) & (col < C)
            if flat is not None:
                # 1-D input reshaped to (R, C): only the first N elements
                # (row-major) are valid; N = rows_full * C + tail.
                rows_full, tail = flat
                mask &= (row < rows_full) | ((row == rows_full) & (col < tail))
            term = jnp.where(mask, term, 0.0)

        # One cross-lane reduce per (large) tile; partial goes to SMEM output.
        o_ref[0, 0] = jnp.sum(term)

    return kernel


@functools.partial(jax.jit, static_argnames=("alpha",))
def alpha_loss(P, Q, alpha: float):
    """Pallas implementation of Alpha_Loss.forward(P, Q, alpha). Returns f32 scalar."""
    assert P.shape == Q.shape, (P.shape, Q.shape)
    alpha = float(alpha)
    is_kl = (alpha == 1.0)

    # Common dtype so the VMEM/tile budget below is counted correctly.
    dtype = jnp.promote_types(P.dtype, Q.dtype)
    if not jnp.issubdtype(dtype, jnp.floating):
        dtype = jnp.float32
    P = P.astype(dtype)
    Q = Q.astype(dtype)
    itemsize = jnp.dtype(dtype).itemsize

    # ---- map input to a 2-D [R, C] slab, contiguous dim on lanes ----
    flat = None  # (rows_full, tail) if a 1-D input was reshaped with a tail pad
    if P.ndim == 0:
        P2, Q2 = P.reshape(1, 1), Q.reshape(1, 1)
    elif P.ndim == 1:
        # Near-square lane-aligned reshape instead of (1, N) (which would
        # inflate 1 row to 8 sublanes and force tiny tiles).
        N = P.shape[0]
        cols = min(_round_up(max(1, math.isqrt(N)), 128), 16384)
        rows = _cdiv(N, cols)
        pad_n = rows * cols - N
        if pad_n:
            # Tiny (< cols elements) tail pad; excluded via the flat mask.
            P = jnp.pad(P, (0, pad_n), constant_values=1.0)
            Q = jnp.pad(Q, (0, pad_n), constant_values=1.0)
            flat = (N // cols, N % cols)
        P2, Q2 = P.reshape(rows, cols), Q.reshape(rows, cols)
    else:
        P2 = P.reshape(-1, P.shape[-1])
        Q2 = Q.reshape(-1, Q.shape[-1])

    R, C = P2.shape
    if R * C == 0:
        total = jnp.float32(0.0)
        if is_kl:
            return total
        return (1.0 / (alpha - 1.0)) * jnp.log(total)

    # ---- static tile selection: balanced, lane-aligned, ~4 MiB per input ----
    R8, C128 = _round_up(R, 8), _round_up(C, 128)
    budget = (4 << 20) // itemsize            # elements per input tile (~4 MiB)

    tc0 = _balanced_block(C128, 128, min(C128, 1024))
    tr = _balanced_block(R8, 8, max(8, budget // tc0))
    # Unused row budget flows into the column tile (short-wide inputs).
    tc = _balanced_block(C128, 128, max(128, budget // tr))
    nr, nc = _cdiv(R, tr), _cdiv(C, tc)

    # v7x megacore: make sure the "parallel" grid has >= 2 blocks whenever the
    # problem is bigger than ~2 MiB (so both TensorCores engage).
    if nr * nc == 1 and R8 * C128 * itemsize > (2 << 20):
        if R8 >= 16:
            tr = _balanced_block(R8, 8, _round_up(_cdiv(R8, 2), 8))
        elif C128 >= 256:
            tc = _balanced_block(C128, 128, _round_up(_cdiv(C128, 2), 128))
        nr, nc = _cdiv(R, tr), _cdiv(C, tc)

    need_mask = (R % tr != 0) or (C % tc != 0) or (flat is not None)

    # Advisory cost estimate for XLA scheduling.
    n_elem = R * C
    if is_kl:
        flops, trans = 3 * n_elem, 2 * n_elem
    elif alpha in (2.0, 0.5):
        flops, trans = 3 * n_elem, 1 * n_elem
    else:
        flops, trans = 5 * n_elem, 3 * n_elem
    cost = pl.CostEstimate(
        flops=flops,
        transcendentals=trans,
        bytes_accessed=2 * n_elem * itemsize + nr * nc * 4,
    )

    # 2 inputs x 2 pipeline buffers x tile, plus headroom; cap at 32 MiB so the
    # same setting is safe on v7x (64 MiB physical VMEM) as well as v5e/v6e.
    tile_bytes = tr * tc * itemsize
    vmem_limit = int(min(32 << 20, max(8 << 20, 4 * tile_bytes + (4 << 20))))

    partials = pl.pallas_call(
        _make_alpha_loss_kernel(alpha, tr, tc, R, C, need_mask, flat),
        out_shape=jax.ShapeDtypeStruct((nr, nc), jnp.float32),
        grid_spec=pltpu.PrefetchScalarGridSpec(
            num_scalar_prefetch=0,
            grid=(nr, nc),
            in_specs=[
                pl.BlockSpec((tr, tc), lambda i, j: (i, j)),
                pl.BlockSpec((tr, tc), lambda i, j: (i, j)),
            ],
            out_specs=pl.BlockSpec(
                (1, 1), lambda i, j: (i, j),
                memory_space=pltpu.MemorySpace.SMEM,
            ),
        ),
        compiler_params=pltpu.CompilerParams(
            dimension_semantics=("parallel", "parallel"),
            vmem_limit_bytes=vmem_limit,
        ),
        cost_estimate=cost,
    )(P2, Q2)

    total = jnp.sum(partials)
    if is_kl:
        return total
    return (1.0 / (alpha - 1.0)) * jnp.log(total)


def alpha_loss_ref(P, Q, alpha: float):
    """Pure-JAX reference mirroring the PyTorch forward."""
    if alpha == 1:
        return jnp.sum(P * jnp.log(P / Q))
    return (1.0 / (alpha - 1.0)) * jnp.log(jnp.sum(P ** alpha * Q ** (1.0 - alpha)))


if __name__ == "__main__":
    key = jax.random.PRNGKey(0)
    kp, kq = jax.random.split(key)

    checks = []

    # 2-D distribution-like inputs, lane-aligned: [R, C] = [16, 256].
    R, C = 16, 256
    P = jax.nn.softmax(jax.random.normal(kp, (R, C), dtype=jnp.float32), axis=-1)
    Q = jax.nn.softmax(jax.random.normal(kq, (R, C), dtype=jnp.float32), axis=-1)
    for a in (1.0, 2.0, 0.5, 3.0):  # KL, fast special cases, generic branch
        checks.append((a, alpha_loss(P, Q, a), alpha_loss_ref(P, Q, a)))

    # Non-aligned 2-D shape -> exercises the in-kernel edge mask (no padding).
    R2, C2 = 37, 300
    Pb = jax.nn.softmax(jax.random.normal(kp, (R2, C2), dtype=jnp.float32), axis=-1)
    Qb = jax.nn.softmax(jax.random.normal(kq, (R2, C2), dtype=jnp.float32), axis=-1)
    for a in (1.0, 2.0):
        checks.append((a, alpha_loss(Pb, Qb, a), alpha_loss_ref(Pb, Qb, a)))

    # 3-D input (flattened to 2-D inside the wrapper).
    Pc = jax.nn.softmax(jax.random.normal(kp, (2, 8, 128), dtype=jnp.float32), axis=-1)
    Qc = jax.nn.softmax(jax.random.normal(kq, (2, 8, 128), dtype=jnp.float32), axis=-1)
    checks.append((1.0, alpha_loss(Pc, Qc, 1.0), alpha_loss_ref(Pc, Qc, 1.0)))

    # 1-D input, not a multiple of 128 -> near-square reshape + flat tail mask.
    N = 1000
    Pd = jax.nn.softmax(jax.random.normal(kp, (N,), dtype=jnp.float32))
    Qd = jax.nn.softmax(jax.random.normal(kq, (N,), dtype=jnp.float32))
    for a in (1.0, 3.0):
        checks.append((a, alpha_loss(Pd, Qd, a), alpha_loss_ref(Pd, Qd, a)))

    jax.block_until_ready([o for _, o, _ in checks])
    for a, out, ref in checks:
        assert jnp.allclose(out, ref, rtol=1e-4, atol=1e-5), (a, float(out), float(ref))

    print("KERNEL_OK")
</pallas_src>

<mosaic_0001>
module attributes {stable_mosaic.version = 11 : i64} {
  func.func @kernel(%arg0: i32, %arg1: i32, %arg2: memref<16x256xf32, #tpu.memory_space<vmem>>, %arg3: memref<16x256xf32, #tpu.memory_space<vmem>>, %arg4: memref<1x1xf32, #tpu.memory_space<smem>>) attributes {dimension_semantics = [#tpu.dimension_semantics<parallel>, #tpu.dimension_semantics<parallel>], iteration_bounds = array<i64: 1, 1>, scalar_prefetch = 0 : i64, scratch_operands = 0 : i64, tpu.core_type = #tpu.core_type<tc>, window_params = [{transform_indices = @transform_0, window_bounds = array<i64: 16, 256>}, {transform_indices = @transform_1, window_bounds = array<i64: 16, 256>}, {transform_indices = @transform_2, window_bounds = array<i64: 1, 1>}]} {
    %c0 = arith.constant 0 : index
    %c0_0 = arith.constant 0 : index
    %0 = vector.load %arg2[%c0, %c0_0] : memref<16x256xf32, #tpu.memory_space<vmem>>, vector<16x256xf32>
    %c0_1 = arith.constant 0 : index
    %c0_2 = arith.constant 0 : index
    %1 = vector.load %arg3[%c0_1, %c0_2] : memref<16x256xf32, #tpu.memory_space<vmem>>, vector<16x256xf32>
    %2 = arith.divf %0, %1 : vector<16x256xf32>
    %3 = math.log %2 : vector<16x256xf32>
    %4 = arith.mulf %0, %3 : vector<16x256xf32>
    %5 = vector.shape_cast %4 : vector<16x256xf32> to vector<1x16x256xf32>
    %cst = arith.constant dense<0.000000e+00> : vector<1xf32>
    %6 = vector.multi_reduction <add>, %5, %cst [1, 2] : vector<1x16x256xf32> to vector<1xf32>
    %7 = vector.shape_cast %6 : vector<1xf32> to vector<1x1x1xf32>
    %8 = vector.extract %7[0, 0, 0] : f32 from vector<1x1x1xf32>
    %c0_3 = arith.constant 0 : index
    %c0_4 = arith.constant 0 : index
    %9 = memref.load %arg4[%c0_3, %c0_4] : memref<1x1xf32, #tpu.memory_space<smem>>
    memref.store %8, %arg4[%c0_3, %c0_4] : memref<1x1xf32, #tpu.memory_space<smem>>
    return
  }
  func.func @transform_0(%arg0: i32, %arg1: i32) -> (i32, i32) {
    %c0_i32 = arith.constant 0 : i32
    return %arg0, %arg1 : i32, i32
  }
  func.func @transform_1(%arg0: i32, %arg1: i32) -> (i32, i32) {
    %c0_i32 = arith.constant 0 : i32
    return %arg0, %arg1 : i32, i32
  }
  func.func @transform_2(%arg0: i32, %arg1: i32) -> (i32, i32) {
    %c0_i32 = arith.constant 0 : i32
    return %arg0, %arg1 : i32, i32
  }
}

</mosaic_0001>

<bundles_post_ra>
// kernel: alpha_loss.1
= control target key start
LH: loop header
LB: loop body
LE: loop exit
PB: predicated region body
PF: predicated region fallthrough
CT: control target
= control target key end

     0   :  { %7 = vsyncpa [#allocation3], 0  ;;  %s203_s0 = inlined_call_operand.hbm [shape: f32[16,256], index: 0, kind: input, shape index: {}]   ;;  %s204_s1 = inlined_call_operand.hbm [shape: f32[16,256], index: 1, kind: input, shape index: {}]   ;;  %s205_s2 = inlined_call_operand.hbm [shape: f32[1,1], index: 2, kind: output, shape index: {}]  }
   0x1   :  { %8 = vsyncpa [#allocation6], 0 }
   0x2   :  { %9 = vsyncpa [#allocation4], 0  ;;  %s174_s9 = smov [#allocation2]  }
   0x3   :  { %s15_s10 = sshll.u32 %s174_s9, 4  ;;  %s16_s10 = int_to_ptr.vmem [resolvable:$true] %s15_s10 }
   0x4   :  { %s128_s11 = scalar_lea.vmem %s16_s10, 512  ;;  %p133_p1 = scmp.lt.s32.totalorder %s16_s10, %s16_s10 }
   0x5   :  { %p129_p0 = scmp.ne.s32.totalorder %s16_s10, %s128_s11  ;;  %p134_p2 = scmp.lt.s32.totalorder %s128_s11, %s128_s11 }
   0x7   :  { %p135_p3 = por %p134_p2, %p133_p1 }
   0x9   :  { %p136_p4 = pnand %p135_p3, %p129_p0 }
   0xb   :  { %139 = shalt.err (!%p136_p4)
}
   0xc   :  { %s175_s12 = smov 256   ;;  %s176_s13 = smov 16  }
   0xd   :  { %21 = dma.hbm_to_vmem [thread:$0]  %s203_s0, 512, %s16_s10, [#allocation3], %s175_s12, %s175_s12, %s176_s13  }
   0xe   :  { %s177_s16 = smov [#allocation5]  }
   0xf   :  { %s27_s17 = sshll.u32 %s177_s16, 4  ;;  %s28_s17 = int_to_ptr.vmem [resolvable:$true] %s27_s17 }
  0x10   :  { %s148_s18 = scalar_lea.vmem %s28_s17, 512  ;;  %p153_p6 = scmp.lt.s32.totalorder %s28_s17, %s28_s17 }
  0x11   :  { %p149_p5 = scmp.ne.s32.totalorder %s28_s17, %s148_s18  ;;  %p154_p7 = scmp.lt.s32.totalorder %s148_s18, %s148_s18 }
  0x13   :  { %p155_p8 = por %p154_p7, %p153_p6 }
  0x15   :  { %p156_p9 = pnand %p155_p8, %p149_p5 }
  0x17   :  { %159 = shalt.err (!%p156_p9)
}
  0x18   :  { %33 = dma.hbm_to_vmem [thread:$0]  %s204_s1, 512, %s28_s17, [#allocation6], %s175_s12, %s175_s12, %s176_s13  }
  0x19   :  { %168 = dma.done.wait [#allocation3], 512  }
  0x1a   :  { %169 = vsyncadd [#allocation3], 4294966784 }
  0x1b   :  { %170 = dma.done.wait [#allocation6], 512  }
  0x1c   :  { %171 = vsyncadd [#allocation6], 4294966784  ;;  %v44_v0 = vld [vmem:[#allocation5] sm:$0xff]  ;;  %v45_v1 = vld [vmem:[#allocation5 + $0x8] sm:$0xff]  ;;  %s178_s1 = smov [#allocation7]  }
  0x1d   :  { %v46_v2 = vld [vmem:[#allocation5 + $0x10] sm:$0xff]  ;;  %v47_v3 = vld [vmem:[#allocation5 + $0x18] sm:$0xff]  ;;  %104 = vrcp.f32 %v44_v0  ;;  %v40_v4 = vld [vmem:[#allocation2] sm:$0xff] }
  0x1e   :  { %106 = vrcp.f32 %v45_v1  ;;  %v41_v5 = vld [vmem:[#allocation2 + $0x8] sm:$0xff]  ;;  %v42_v7 = vld [vmem:[#allocation2 + $0x10] sm:$0xff]  ;;  %v43_v9 = vld [vmem:[#allocation2 + $0x18] sm:$0xff] }
  0x1f   :  { %108 = vrcp.f32 %v46_v2 }
  0x20   :  { %110 = vrcp.f32 %v47_v3 }
  0x2a   :  { %v105_v6 = vpop.eup %104 }
  0x2b   :  { %v107_v8 = vpop.eup %106  ;;  %v49_v10 = vmul.f32 %v105_v6, %v40_v4 }
  0x2c   :  { %v109_v11 = vpop.eup %108  ;;  %v51_v12 = vmul.f32 %v107_v8, %v41_v5 }
  0x2d   :  { %v111_v13 = vpop.eup %110  ;;  %v53_v14 = vmul.f32 %v109_v11, %v42_v7  ;;  %112 = vlog2.f32 %v49_v10 }
  0x2e   :  { %v55_v15 = vmul.f32 %v111_v13, %v43_v9  ;;  %114 = vlog2.f32 %v51_v12 }
  0x2f   :  { %116 = vlog2.f32 %v53_v14 }
  0x30   :  { %118 = vlog2.f32 %v55_v15 }
  0x3a   :  { %v113_v16 = vpop.eup %112 }
  0x3b   :  { %v115_v17 = vpop.eup %114  ;;  %v57_v18 = vmul.f32 0.6931472, %v113_v16 }
  0x3c   :  { %v117_v19 = vpop.eup %116  ;;  %v59_v20 = vmul.f32 0.6931472, %v115_v17 }
  0x3d   :  { %v119_v21 = vpop.eup %118  ;;  %v61_v22 = vmul.f32 0.6931472, %v117_v19  ;;  %v64_v23 = vmul.f32 %v57_v18, %v40_v4 }
  0x3e   :  { %v63_v24 = vmul.f32 0.6931472, %v119_v21  ;;  %v65_v25 = vmul.f32 %v59_v20, %v41_v5 }
  0x3f   :  { %v66_v26 = vmul.f32 %v61_v22, %v42_v7 }
  0x40   :  { %v67_v27 = vmul.f32 %v63_v24, %v43_v9  ;;  %v68_v28 = vadd.f32 %v65_v25, %v64_v23 }
  0x42   :  { %v69_v29 = vadd.f32 %v68_v28, %v66_v26 }
  0x44   :  { %v70_v30 = vadd.f32 %v69_v29, %v67_v27 }
  0x46   :  { %71 = vadd.xlane.f32.xlu0 %v70_v30 }
  0xcf   :  { %v72_v31 = vpop.xlane.xlu0 %71 }
  0xd0   :  { %v73_v32 = vrot.slane %v72_v31, 4 }
  0xd2   :  { %v74_v33 = vadd.f32 %v73_v32, %v72_v31 }
  0xd4   :  { %v75_v34 = vrot.slane %v74_v33, 2 }
  0xd6   :  { %v76_v35 = vadd.f32 %v75_v34, %v74_v33 }
  0xd8   :  { %v77_v36 = vrot.slane %v76_v35, 1 }
  0xda   :  { %v78_v37 = vadd.f32 %v77_v36, %v76_v35 }
  0xdc   :  { %97 = vpush %v78_v37 }
 0x10d   :  { %s98_s0 = spop %97 }
 0x10e   :  { %81 = sst [smem:[#allocation7]] %s98_s0 }
 0x10f   :  { %89 = dma.smem_to_hbm %s178_s1, 16, %s205_s2, [#allocation4]  }
 0x110   :  { %172 = dma.done.wait [#allocation4], 16  }
 0x111   :  { %173 = vsyncadd [#allocation4], 4294967280 }
 0x112   :  { %93 = sfence }
 0x113   :  { %94 = vsyncpa [#allocation3], 1 }
 0x114   :  { %95 = vsyncpa [#allocation6], 1 }
 0x115   :  { %96 = vsyncpa [#allocation4], 1 }

</bundles_post_ra>
